<compile_context>
chip_gen: v7x
topology: tpu7x:2x2x1
jax: 0.10.0
libtpu: 0.0.40
codegen_flags: <defaults>
</compile_context>

<pallas_src>
from enum import IntEnum

import jax
import jax.numpy as jnp
from jax.experimental import pallas as pl
from jax.experimental.pallas import tpu as pltpu


class ModalityEmbeddingsID(IntEnum):
    TEXT_QUESTION = 0
    TEXT_EMBEDDING = 1
    TEXT_UNUSED = 2
    VISUAL_EMBEDDING = 3
    VISUAL_UNUSED = 4


NUM_IDS = len(ModalityEmbeddingsID)                      # 5
_TEXT_ROW = int(ModalityEmbeddingsID.TEXT_QUESTION)      # 0
_VIS_ROW = int(ModalityEmbeddingsID.VISUAL_EMBEDDING)    # 3


def _modality_embed_kernel(num_txt_ref, table_ref, out_ref):
    """Write one (TILE_L, D) slab of modality embeddings.

    num_txt_ref: (1,)          int32, SMEM (scalar prefetch)
    table_ref:   (NUM_IDS, D)  float32, VMEM (whole tiny table resident every step)
    out_ref:     (TILE_L, D)   float32, VMEM
    """
    tile_l, d = out_ref.shape
    num_txt = num_txt_ref[0]
    row_start = pl.program_id(0) * tile_l

    text_row = table_ref[_TEXT_ROW:_TEXT_ROW + 1, :]   # (1, D)
    vis_row = table_ref[_VIS_ROW:_VIS_ROW + 1, :]      # (1, D)

    all_text = row_start + tile_l <= num_txt
    all_vis = row_start >= num_txt

    # Steady-state tiles: pure sublane broadcast of one table row, full-tile store.
    @pl.when(all_text)
    def _():
        out_ref[...] = jnp.broadcast_to(text_row, (tile_l, d))

    @pl.when(all_vis)
    def _():
        out_ref[...] = jnp.broadcast_to(vis_row, (tile_l, d))

    # The single tile straddling num_txt: per-row select; mask built from a
    # (TILE_L, 1) sublane iota and broadcast along lanes by the where.
    @pl.when(jnp.logical_not(jnp.logical_or(all_text, all_vis)))
    def _():
        row = jax.lax.broadcasted_iota(jnp.int32, (tile_l, 1), 0) + row_start
        out_ref[...] = jnp.where(row < num_txt, text_row, vis_row)


def _round_up(x: int, m: int) -> int:
    return ((x + m - 1) // m) * m


def _choose_tile_l(l_out: int, d: int) -> int:
    """Sublane-aligned L tile: ~4 MiB f32 output block (8 MiB double-buffered) to sit
    near the mem-bound roofline on v5e/v6e, capped at ceil(L_out/2) rows so the grid
    has >=2 steps whenever possible (both v7x TensorCores participate)."""
    target_block_bytes = 4 << 20
    tile_l = max(8, (target_block_bytes // max(d * 4, 1)) // 8 * 8)
    tile_l = min(tile_l, max(8, _round_up(pl.cdiv(l_out, 2), 8)))
    return tile_l


def modality_embeddings_forward(
    x: jax.Array,
    num_frame: int,
    embedding_table: jax.Array,
    *,
    use_text_query: bool = True,
):
    """JAX/Pallas equivalent of ModalityEmbeddings.forward.

    x:               (L, N, D) — only its shape is used (as in the torch module)
    num_frame:       static Python int
    embedding_table: (NUM_IDS, D) float32
    returns:         (L_out, 1, D) float32, L_out = (L - num_frame)*use_text_query + num_frame
    """
    if not isinstance(num_frame, int):
        raise TypeError("num_frame must be a static Python int (it defines the output shape)")

    L, N, D = x.shape
    num_txt = (L - num_frame) if use_text_query else 0
    L_out = num_txt + num_frame

    if L_out == 0:
        return jnp.zeros((0, 1, D), jnp.float32)

    table = embedding_table.astype(jnp.float32)
    TILE_L = _choose_tile_l(L_out, D)
    grid = (pl.cdiv(L_out, TILE_L),)

    # num_txt goes in as a runtime SMEM scalar — no id array DMA, no recompile
    # when num_frame changes (for a fixed L_out / output shape).
    num_txt_arr = jnp.asarray([num_txt], dtype=jnp.int32)

    out = pl.pallas_call(
        _modality_embed_kernel,
        out_shape=jax.ShapeDtypeStruct((L_out, D), jnp.float32),
        grid_spec=pltpu.PrefetchScalarGridSpec(
            num_scalar_prefetch=1,
            grid=grid,
            in_specs=[
                # Tiny table: full-array block, resident every step.
                pl.BlockSpec((NUM_IDS, D), lambda i, num_txt_ref: (0, 0)),
            ],
            out_specs=pl.BlockSpec((TILE_L, D), lambda i, num_txt_ref: (i, 0)),
        ),
        compiler_params=pltpu.CompilerParams(
            dimension_semantics=("parallel",),  # rows split across TCs on v7x megacore
        ),
        cost_estimate=pl.CostEstimate(
            flops=0,
            transcendentals=0,
            bytes_accessed=L_out * D * 4 + NUM_IDS * D * 4,
        ),
    )(num_txt_arr, table)

    # (L_out, D) -> (L_out, 1, D) is a free metadata reshape (no extra HBM pass).
    return out.reshape(L_out, 1, D)


if __name__ == "__main__":
    # Small shapes consistent with the forward: x of size (L, N, D).
    L, N, D = 8, 2, 32
    num_frame = 6

    key = jax.random.PRNGKey(0)
    k_x, k_emb = jax.random.split(key)
    x = jax.random.normal(k_x, (L, N, D), dtype=jnp.float32)
    # nn.Embedding(num_embeddings=5, embedding_dim=D) — deterministic normal init.
    embedding_table = jax.random.normal(k_emb, (NUM_IDS, D), dtype=jnp.float32)

    fwd = jax.jit(
        modality_embeddings_forward,
        static_argnums=(1,),
        static_argnames=("use_text_query",),
    )
    out = fwd(x, num_frame, embedding_table, use_text_query=True)
    out = jax.block_until_ready(out)

    # Reference check (plain JAX gather).
    num_txt = L - num_frame
    ref_ids = jnp.asarray([_TEXT_ROW] * num_txt + [_VIS_ROW] * num_frame, dtype=jnp.int32)
    ref = embedding_table[ref_ids][:, None, :]
    assert out.shape == (L, 1, D), out.shape
    assert jnp.allclose(out, ref, atol=1e-6), "mismatch vs reference gather"

    print("KERNEL_OK")
</pallas_src>

<mosaic_0001>
module attributes {stable_mosaic.version = 11 : i64} {
  func.func @_modality_embed_kernel(%arg0: i32, %arg1: memref<1xi32, #tpu.memory_space<smem>>, %arg2: memref<5x32xf32, #tpu.memory_space<vmem>>, %arg3: memref<8x32xf32, #tpu.memory_space<vmem>>) attributes {dimension_semantics = [#tpu.dimension_semantics<parallel>], iteration_bounds = array<i64: 1>, scalar_prefetch = 1 : i64, scratch_operands = 0 : i64, tpu.core_type = #tpu.core_type<tc>, window_params = [{pipeline_mode = #tpu.pipeline_mode<synchronous>, transform_indices = @transform_0, window_bounds = array<i64: 5, 32>}, {transform_indices = @transform_1, window_bounds = array<i64: 8, 32>}]} {
    %c0 = arith.constant 0 : index
    %0 = memref.load %arg1[%c0] : memref<1xi32, #tpu.memory_space<smem>>
    %c8_i32 = arith.constant 8 : i32
    %1 = arith.muli %arg0, %c8_i32 : i32
    %c0_0 = arith.constant 0 : index
    %c0_1 = arith.constant 0 : index
    %2 = vector.load %arg2[%c0_0, %c0_1] : memref<5x32xf32, #tpu.memory_space<vmem>>, vector<1x32xf32>
    %c3 = arith.constant 3 : index
    %c0_2 = arith.constant 0 : index
    %3 = vector.load %arg2[%c3, %c0_2] : memref<5x32xf32, #tpu.memory_space<vmem>>, vector<1x32xf32>
    %c8_i32_3 = arith.constant 8 : i32
    %4 = arith.addi %1, %c8_i32_3 : i32
    %5 = arith.cmpi sle, %4, %0 : i32
    %6 = arith.cmpi sge, %1, %0 : i32
    %7 = arith.extui %5 : i1 to i32
    %c0_i32 = arith.constant 0 : i32
    %8 = arith.cmpi ne, %7, %c0_i32 : i32
    scf.if %8 {
      %15 = vector.shape_cast %2 : vector<1x32xf32> to vector<1x32xf32>
      %16 = vector.broadcast %15 : vector<1x32xf32> to vector<8x32xf32>
      %c0_6 = arith.constant 0 : index
      %c0_7 = arith.constant 0 : index
      %17 = vector.load %arg3[%c0_6, %c0_7] : memref<8x32xf32, #tpu.memory_space<vmem>>, vector<8x32xf32>
      tpu.vector_store %arg3[%c0_6, %c0_7], %16 {strides = array<i32>} : memref<8x32xf32, #tpu.memory_space<vmem>>, vector<8x32xf32>,
    } else {
    }
    %9 = arith.extui %6 : i1 to i32
    %c0_i32_4 = arith.constant 0 : i32
    %10 = arith.cmpi ne, %9, %c0_i32_4 : i32
    scf.if %10 {
      %15 = vector.shape_cast %3 : vector<1x32xf32> to vector<1x32xf32>
      %16 = vector.broadcast %15 : vector<1x32xf32> to vector<8x32xf32>
      %c0_6 = arith.constant 0 : index
      %c0_7 = arith.constant 0 : index
      %17 = vector.load %arg3[%c0_6, %c0_7] : memref<8x32xf32, #tpu.memory_space<vmem>>, vector<8x32xf32>
      tpu.vector_store %arg3[%c0_6, %c0_7], %16 {strides = array<i32>} : memref<8x32xf32, #tpu.memory_space<vmem>>, vector<8x32xf32>,
    } else {
    }
    %11 = arith.ori %5, %6 : i1
    %true = arith.constant true
    %12 = arith.xori %11, %true : i1
    %13 = arith.extui %12 : i1 to i32
    %c0_i32_5 = arith.constant 0 : i32
    %14 = arith.cmpi ne, %13, %c0_i32_5 : i32
    scf.if %14 {
      %15 = tpu.iota {dimensions = array<i32: 0>} : vector<8x1xi32>
      %16 = vector.broadcast %1 : i32 to vector<8x1xi32>
      %17 = arith.addi %15, %16 : vector<8x1xi32>
      %18 = vector.broadcast %0 : i32 to vector<8x1xi32>
      %19 = arith.cmpi slt, %17, %18 : vector<8x1xi32>
      %20 = vector.shape_cast %19 : vector<8x1xi1> to vector<8x1xi1>
      %21 = vector.broadcast %20 : vector<8x1xi1> to vector<8x32xi1>
      %22 = vector.shape_cast %2 : vector<1x32xf32> to vector<1x32xf32>
      %23 = vector.broadcast %22 : vector<1x32xf32> to vector<8x32xf32>
      %24 = vector.shape_cast %3 : vector<1x32xf32> to vector<1x32xf32>
      %25 = vector.broadcast %24 : vector<1x32xf32> to vector<8x32xf32>
      %26 = arith.select %21, %23, %25 : vector<8x32xi1>, vector<8x32xf32>
      %c0_6 = arith.constant 0 : index
      %c0_7 = arith.constant 0 : index
      %27 = vector.load %arg3[%c0_6, %c0_7] : memref<8x32xf32, #tpu.memory_space<vmem>>, vector<8x32xf32>
      tpu.vector_store %arg3[%c0_6, %c0_7], %26 {strides = array<i32>} : memref<8x32xf32, #tpu.memory_space<vmem>>, vector<8x32xf32>,
    } else {
    }
    return
  }
  func.func @transform_0(%arg0: i32, %arg1: memref<1xi32, #tpu.memory_space<smem>>) -> (i32, i32) {
    %c0_i32 = arith.constant 0 : i32
    %c0_i32_0 = arith.constant 0 : i32
    %c0_i32_1 = arith.constant 0 : i32
    return %c0_i32, %c0_i32_0 : i32, i32
  }
  func.func @transform_1(%arg0: i32, %arg1: memref<1xi32, #tpu.memory_space<smem>>) -> (i32, i32) {
    %c0_i32 = arith.constant 0 : i32
    %c0_i32_0 = arith.constant 0 : i32
    return %arg0, %c0_i32 : i32, i32
  }
}

</mosaic_0001>

<bundles_post_ra>
// kernel: modality_embeddings_forward.1
= control target key start
LH: loop header
LB: loop body
LE: loop exit
PB: predicated region body
PF: predicated region fallthrough
CT: control target
= control target key end

     0   :  { %8 = vsyncpa [#allocation5], 0  ;;  %s204_s0 = inlined_call_operand.<no memory space> [shape: s32[1], index: 0, kind: input, shape index: {}]   ;;  %s205_s1 = inlined_call_operand.hbm [shape: f32[5,32], index: 1, kind: input, shape index: {}]   ;;  %s206_s2 = inlined_call_operand.hbm [shape: f32[8,32], index: 2, kind: output, shape index: {}]  }
   0x1   :  { %9 = vsyncpa [#allocation6], 0  ;;  %s140_s9 = smov [#allocation4]   ;;  %s92_s13 = scalar_lea.hbm %s205_s1, 128 }
   0x2   :  { %s16_s10 = sshll.u32 %s140_s9, 4  ;;  %p93_p0 = scmp.ne.s32.totalorder %s205_s1, %s92_s13  ;;  %s17_s10 = int_to_ptr.vmem [resolvable:$true] %s16_s10 }
   0x3   :  { %p96_p1 = scmp.lt.u32.totalorder %s92_s13, %s205_s1 }
   0x5   :  { %p98_p2 = pnand %p96_p1, %p93_p0 }
   0x7   :  { %101 = shalt.err (!%p98_p2)
}
   0x8   :  { %s102_s18 = scalar_lea.vmem %s17_s10, 128  ;;  %p107_p4 = scmp.lt.s32.totalorder %s17_s10, %s17_s10 }
   0x9   :  { %p103_p3 = scmp.ne.s32.totalorder %s17_s10, %s102_s18  ;;  %p108_p5 = scmp.lt.s32.totalorder %s102_s18, %s102_s18 }
   0xb   :  { %p109_p6 = por %p108_p5, %p107_p4 }
   0xd   :  { %p110_p7 = pnand %p109_p6, %p103_p3 }
   0xf   :  { %113 = shalt.err (!%p110_p7)
}
  0x10   :  { %19 = dma.hbm_to_vmem [thread:$0]  %s205_s1, 128, %s17_s10, [#allocation5]  }
  0x11   :  { %136 = dma.done.wait [#allocation5], 128  }
  0x12   :  { %137 = vsyncadd [#allocation5], 4294967168  ;;  %p86_p8 = scmp.ge.s32.totalorder %s204_s0, 8  ;;  %p87_p9 = scmp.le.s32.totalorder %s204_s0, 0  ;;  %v25_v0 = vld [vmem:[#allocation4] sm:$0x1] }
  0x13   :  { %v26_v1 = vld [vmem:[#allocation4 + $0x3] sm:$0x1]  ;;  %p88_p10 = scmp.lt.s32.totalorder %s204_s0, 8 }
  0x14   :  { %v33_v2 = vlaneseq (!%p88_p10)  ;;  %vm37_vm0 = vcmask (!%p88_p10), 261120  }
  0x15   :  { %32 = sbr.rel (%p88_p10) target bundleno = 29 (0x1d), region = 13 }
  0x16   :  { %v34_v3 = vshrl.u32 (!%p88_p10), %v33_v2, 7 }
  0x18   :  { %v35_v4 = vsub.s32 (!%p88_p10), 0, %v34_v3 }
  0x1a   :  { %v36_v5 = vrot.slane (!%p88_p10), %v25_v0, %v35_v4 }
  0x1c   :  { %38 = vst.msk [vmem:[#allocation7] sm:$0xff] %vm37_vm0, %v36_v5 }
  0x1d PF:  { %p89_p11 = scmp.gt.s32.totalorder %s204_s0, 0 }
  0x1e   :  { %v42_v6 = vlaneseq (!%p89_p11)  ;;  %vm46_vm1 = vcmask (!%p89_p11), 261120  }
  0x1f   :  { %41 = sbr.rel (%p89_p11) target bundleno = 39 (0x27), region = 17 }
  0x20   :  { %v43_v7 = vshrl.u32 (!%p89_p11), %v42_v6, 7 }
  0x22   :  { %v44_v8 = vsub.s32 (!%p89_p11), 0, %v43_v7 }
  0x24   :  { %v45_v9 = vrot.slane (!%p89_p11), %v26_v1, %v44_v8 }
  0x26   :  { %47 = vst.msk [vmem:[#allocation7] sm:$0xff] %vm46_vm1, %v45_v9 }
  0x27 PF:  { %p48_p12 = por %p87_p9, %p86_p8 }
  0x28   :  { %v52_v10 = vlaneseq (!%p48_p12)  ;;  %v56_v12 = vstv (!%p48_p12), %s204_s0  ;;  %vm69_vm3 = vcmask (!%p48_p12), 261120  }
  0x29   :  { %51 = sbr.rel (%p48_p12) target bundleno = 50 (0x32), region = 21 }
  0x2a   :  { %v53_v11 = vshrl.u32 (!%p48_p12), %v52_v10, 7 }
  0x2c   :  { %v62_v13 = vsub.s32 (!%p48_p12), 0, %v53_v11  ;;  %vm57_vm2 = vcmp.lt.s32.totalorder (!%p48_p12), %v53_v11, %v56_v12 }
  0x2e   :  { %v63_v14 = vrot.slane (!%p48_p12), %v25_v0, %v62_v13  ;;  %v67_v15 = vrot.slane (!%p48_p12), %v26_v1, %v62_v13 }
  0x30   :  { %v68_v16 = vsel %vm57_vm2, %v63_v14, %v67_v15 }
  0x31   :  { %70 = vst.msk [vmem:[#allocation7] sm:$0xff] %vm69_vm3, %v68_v16 }
  0x32 PF:  { %s141_s6 = smov [#allocation7]  }
  0x33   :  { %s77_s7 = sshll.u32 %s141_s6, 4  ;;  %s78_s7 = int_to_ptr.vmem [resolvable:$true] %s77_s7 }
  0x34   :  { %s114_s8 = scalar_lea.vmem %s78_s7, 128  ;;  %p119_p0 = scmp.lt.s32.totalorder %s78_s7, %s78_s7 }
  0x35   :  { %p115_p13 = scmp.ne.s32.totalorder %s78_s7, %s114_s8  ;;  %p120_p1 = scmp.lt.s32.totalorder %s114_s8, %s114_s8 }
  0x37   :  { %p121_p2 = por %p120_p1, %p119_p0 }
  0x39   :  { %p122_p3 = pnand %p121_p2, %p115_p13 }
  0x3b   :  { %125 = shalt.err (!%p122_p3)
}
  0x3c   :  { %s126_s10 = scalar_lea.hbm %s206_s2, 128 }
  0x3d   :  { %p127_p4 = scmp.ne.s32.totalorder %s206_s2, %s126_s10  ;;  %p130_p5 = scmp.lt.u32.totalorder %s126_s10, %s206_s2 }
  0x3f   :  { %p132_p6 = pnand %p130_p5, %p127_p4 }
  0x41   :  { %135 = shalt.err (!%p132_p6)
}
  0x42   :  { %80 = dma.vmem_to_hbm [thread:$0]  %s78_s7, 128, %s206_s2, [#allocation6]  }
  0x43   :  { %138 = dma.done.wait [#allocation6], 128  }
  0x44   :  { %139 = vsyncadd [#allocation6], 4294967168 }
  0x45   :  { %84 = vsyncpa [#allocation5], 1 }
  0x46   :  { %85 = vsyncpa [#allocation6], 1 }

</bundles_post_ra>
